<compile_context>
chip_gen: v7x
topology: tpu7x:2x2x1
jax: 0.10.0
libtpu: 0.0.40
codegen_flags: <defaults>
</compile_context>

<pallas_src>
import numpy as np
import jax
import jax.numpy as jnp
from jax.experimental import pallas as pl
from jax.experimental.pallas import tpu as pltpu

FEATURE_DIM = 32
HIDDEN_DIM = 32            # must be divisible by NUM_HEADS
NUM_DOMAIN_TYPES = 16
NUM_HEADS = 8
BATCH = 2
SEQ = 16
OUT_SLAB = 128             # lane-dense packed output width (>= 7)
BIAS_ROW = 128             # packed bias row width


def _full_spec1(shape):
    """BlockSpec covering the whole array for a grid=(1,) kernel."""
    nd = len(shape)
    def idx(i):
        return (0,) * nd
    return pl.BlockSpec(shape, idx)


def _bcast_spec(shape):
    """Whole-array BlockSpec for grid=(B,) + 1 scalar-prefetch operand."""
    nd = len(shape)
    def idx(b, nv):
        return (0,) * nd
    return pl.BlockSpec(shape, idx)


def _dmax_bucket(S):
    """Static domain-slot bucket: >= max possible domains, multiple of 8."""
    need = (S + 1) // 2
    return max(8, ((need + 7) // 8) * 8)


# --------------------------------------------------------------------------
# Fused kernel: boundary detector (3 convs) + functional-site MLP.
#   conv1 + site layer-1 : one matmul on wrapper-built im2col patches
#   conv2 + site layer-2 : one matmul (shift-on-output taps for conv2)
#   conv3                : one matmul (shift-on-output taps)
# Output packed into one lane-dense [B*S, 128] slab:
#   cols 0:2 = boundary probabilities (softmax), cols 2:7 = site sigmoids.
# --------------------------------------------------------------------------
def make_fused_kernel(S, H, H2):
    def kernel(p1_ref, wa_ref, wb_ref, wc_ref, bias_ref, out_ref):
        BS = p1_ref.shape[0]

        # sequence position of each flattened row, computed in-kernel (no DMA)
        row = jax.lax.broadcasted_iota(jnp.int32, (BS, 1), 0)
        if (S & (S - 1)) == 0:
            pos = jnp.bitwise_and(row, S - 1)
        else:
            pos = jnp.remainder(row, S)

        bias = bias_ref[...]                              # [1, 128] packed
        b_a  = bias[:, 0:2 * H]                           # conv1_b | site_b1
        b_c2 = bias[:, 2 * H:2 * H + H2]
        b_c3 = bias[:, 2 * H + H2:2 * H + H2 + 2]
        b_s2 = bias[:, 2 * H + H2 + 2:2 * H + H2 + 7]

        # conv1 (k=9, pad 4) and site-MLP layer 1, one matmul (shared LHS)
        big = jnp.maximum(
            jnp.dot(p1_ref[...], wa_ref[...],
                    preferred_element_type=jnp.float32) + b_a, 0.0)   # [BS,2H]

        # conv2 tap-matrix and site-MLP layer 2, one matmul
        ybc = jnp.dot(big, wb_ref[...],
                      preferred_element_type=jnp.float32)             # [BS,5*H2+5]

        def tap_sum(y, K, cout):
            # out[i, co] = sum_k y[i + (k - P), k*cout + co], zero outside seq
            P = (K - 1) // 2
            acc = None
            for k in range(K):
                d = k - P
                sl = y[:, k * cout:(k + 1) * cout]
                if d != 0:
                    sl = jnp.roll(sl, -d, axis=0)          # sl[i] <- y[i+d]
                    valid = jnp.logical_and(pos + d >= 0, pos + d < S)
                    sl = jnp.where(valid, sl, 0.0)
                acc = sl if acc is None else acc + sl
            return acc

        # conv2 (k=5, pad 2) via shift-on-output taps
        h2 = jnp.maximum(tap_sum(ybc, 5, H2) + b_c2, 0.0)              # [BS,H2]

        # conv3 (k=3, pad 1)
        y3 = jnp.dot(h2, wc_ref[...],
                     preferred_element_type=jnp.float32)               # [BS, 6]
        logits = tap_sum(y3, 3, 2) + b_c3                              # [BS, 2]

        # 2-channel softmax == exact pair of (numerically stable) sigmoids
        dlt = logits[:, 0:1] - logits[:, 1:2]
        e = jnp.exp(-jnp.abs(dlt))
        p_lo = e / (1.0 + e)
        p_hi = 1.0 / (1.0 + e)
        p_start = jnp.where(dlt >= 0, p_hi, p_lo)
        p_end   = jnp.where(dlt >= 0, p_lo, p_hi)

        # functional sites: stable sigmoid of the fused layer-2 output
        sy = ybc[:, 5 * H2:5 * H2 + 5] + b_s2
        es = jnp.exp(-jnp.abs(sy))
        sites = jnp.where(sy >= 0, 1.0 / (1.0 + es), es / (1.0 + es))  # [BS,5]

        pad = jnp.zeros((BS, out_ref.shape[1] - 7), jnp.float32)
        out_ref[...] = jnp.concatenate([p_start, p_end, sites, pad], axis=-1)
    return kernel


@jax.jit
def _boundary_sites_jit(features, w_a, w_b, w_c, bias_row):
    B, S, F = features.shape
    BS = B * S
    H = w_a.shape[1] // 2
    H2 = w_c.shape[0]

    # im2col for conv1 in plain XLA (same-pad, kernel 9)
    xp = jnp.pad(features, ((0, 0), (4, 4), (0, 0)))                   # [B,S+8,F]
    patches1 = jnp.concatenate([xp[:, j:j + S, :] for j in range(9)],
                               axis=-1).reshape(BS, 9 * F)             # [BS,9F]

    args = (patches1, w_a, w_b, w_c, bias_row)
    slab = pl.pallas_call(
        make_fused_kernel(S, H, H2),
        out_shape=jax.ShapeDtypeStruct((BS, OUT_SLAB), jnp.float32),
        grid=(1,),
        in_specs=[_full_spec1(a.shape) for a in args],
        out_specs=pl.BlockSpec((BS, OUT_SLAB), lambda i: (0, 0)),
        compiler_params=pltpu.CompilerParams(
            dimension_semantics=("arbitrary",)),
    )(*args)

    boundary_probs = slab[:, 0:2].reshape(B, S, 2)
    functional_sites = slab[:, 2:7].reshape(B, S, 5)
    return boundary_probs, functional_sites


# --------------------------------------------------------------------------
# Fused domain kernel: classifier logits + 8-head self-attention on the
# padded [B, DMAX, F] domain-feature block.  The actual max domain count is a
# runtime scalar (scalar prefetch); bucket-padding keys are masked so the
# attention matches the reference (unmasked over the actual max_d) exactly.
# --------------------------------------------------------------------------
def make_interaction_kernel(num_heads):
    def kernel(nvalid_ref, x_ref, w1_ref, b1_ref, whc_ref, bhc_ref,
               wo_ref, bo_ref, o_ref, logit_ref):
        H = w1_ref.shape[1]
        hd = H // num_heads
        scale = 1.0 / float(np.sqrt(hd))
        ndt = logit_ref.shape[2]
        nvalid = nvalid_ref[0]

        x = x_ref[0]                                                   # [D, F]
        D = x.shape[0]
        R = num_heads * D

        # shared hidden (== classifier layer 1 == attention input in the ref)
        h = jnp.maximum(
            jnp.dot(x, w1_ref[...],
                    preferred_element_type=jnp.float32) + b1_ref[...], 0.0)
        # fused QKV projection + classifier layer 2 (Dropout identity in eval)
        hc = jnp.dot(h, whc_ref[...],
                     preferred_element_type=jnp.float32) + bhc_ref[...]  # [D,3H+ndt]
        q = hc[:, 0:H]
        k = hc[:, H:2 * H]
        v = hc[:, 2 * H:3 * H]
        logit_ref[0] = hc[:, 3 * H:3 * H + ndt]

        # head-replicated rows with a head-column mask: all heads in 2 matmuls
        row_head = jax.lax.broadcasted_iota(jnp.int32, (R, H), 0) // D
        col_head = jax.lax.broadcasted_iota(jnp.int32, (R, H), 1) // hd
        head_mask = (row_head == col_head).astype(jnp.float32)          # [R, H]

        q_rep = jnp.concatenate([q] * num_heads, axis=0) * head_mask    # [R, H]
        s = jax.lax.dot_general(q_rep, k, (((1,), (1,)), ((), ())),
                                preferred_element_type=jnp.float32) * scale  # [R,D]

        # mask out bucket-padding key slots (>= actual max_d)
        key_idx = jax.lax.broadcasted_iota(jnp.int32, (R, D), 1)
        s = jnp.where(key_idx < nvalid, s, -1e30)

        m = jnp.max(s, axis=-1, keepdims=True)
        p = jnp.exp(s - m)
        p = p / jnp.sum(p, axis=-1, keepdims=True)

        ctx = jnp.dot(p, v, preferred_element_type=jnp.float32) * head_mask  # [R,H]

        # sum the (column-disjoint) head blocks -> concat-heads layout [D, H]
        cat = ctx[0:D, :]
        for hh in range(1, num_heads):
            cat = cat + ctx[hh * D:(hh + 1) * D, :]

        o_ref[0] = jnp.dot(cat, wo_ref[...],
                           preferred_element_type=jnp.float32) + bo_ref[...]
    return kernel


@jax.jit
def _interactions_jit(padded, nvalid, cls_w1, cls_b1, w_hc, b_hc,
                      attn_wo, attn_bo):
    B, Dm, F = padded.shape
    H = cls_w1.shape[1]
    ndt = w_hc.shape[1] - 3 * H
    weight_args = (cls_w1, cls_b1, w_hc, b_hc, attn_wo, attn_bo)

    grid_spec = pltpu.PrefetchScalarGridSpec(
        num_scalar_prefetch=1,
        grid=(B,),
        in_specs=[pl.BlockSpec((1, Dm, F), lambda b, nv: (b, 0, 0))]
                 + [_bcast_spec(w.shape) for w in weight_args],
        out_specs=[pl.BlockSpec((1, Dm, H), lambda b, nv: (b, 0, 0)),
                   pl.BlockSpec((1, Dm, ndt), lambda b, nv: (b, 0, 0))],
    )
    return pl.pallas_call(
        make_interaction_kernel(NUM_HEADS),
        out_shape=(jax.ShapeDtypeStruct((B, Dm, H), jnp.float32),
                   jax.ShapeDtypeStruct((B, Dm, ndt), jnp.float32)),
        grid_spec=grid_spec,
        compiler_params=pltpu.CompilerParams(
            dimension_semantics=("parallel",)),                 # 2 TCs on v7x
    )(nvalid, padded, *weight_args)


# --------------------------------------------------------------------------
# One-time weight packing (done outside the per-call path).
# --------------------------------------------------------------------------
def pack_params(params):
    F, H = FEATURE_DIM, HIDDEN_DIM
    H2 = H // 2

    # conv1 + site layer-1 fused weight: [9F, 2H]
    w1r = params['conv1_w'].reshape(9 * F, H)
    sw1_pad = jnp.zeros((9 * F, H), jnp.float32).at[4 * F:5 * F, :].set(
        params['site_w1'])
    w_a = jnp.concatenate([w1r, sw1_pad], axis=1)

    # conv2 (shift-on-output layout) + site layer-2 fused weight: [2H, 5*H2+5]
    w2_flat = jnp.transpose(params['conv2_w'], (1, 0, 2)).reshape(H, 5 * H2)
    w_b = (jnp.zeros((2 * H, 5 * H2 + 5), jnp.float32)
           .at[:H, :5 * H2].set(w2_flat)
           .at[H:, 5 * H2:].set(params['site_w2']))

    # conv3 shift-on-output weight: [H2, 6]
    w_c = jnp.transpose(params['conv3_w'], (1, 0, 2)).reshape(H2, 3 * 2)

    # all biases packed into one lane-dense row
    bias_row = (jnp.zeros((1, BIAS_ROW), jnp.float32)
                .at[:, 0:H].set(params['conv1_b'])
                .at[:, H:2 * H].set(params['site_b1'])
                .at[:, 2 * H:2 * H + H2].set(params['conv2_b'])
                .at[:, 2 * H + H2:2 * H + H2 + 2].set(params['conv3_b'])
                .at[:, 2 * H + H2 + 2:2 * H + H2 + 7].set(params['site_b2']))

    # fused QKV + classifier layer-2 projection: [H, 3H + NDT]
    w_hc = jnp.concatenate([params['attn_wq'], params['attn_wk'],
                            params['attn_wv'], params['cls_w2']], axis=1)
    b_hc = jnp.concatenate([params['attn_bq'], params['attn_bk'],
                            params['attn_bv'], params['cls_b2']], axis=1)

    return {
        'W_A': w_a, 'W_B': w_b, 'W_C': w_c, 'bias_row': bias_row,
        'cls_w1': params['cls_w1'], 'cls_b1': params['cls_b1'],
        'W_hc': w_hc, 'b_hc': b_hc,
        'attn_wo': params['attn_wo'], 'attn_bo': params['attn_bo'],
    }


# --------------------------------------------------------------------------
# Host-side glue (data-dependent, ragged) — mirrors the PyTorch numpy loop.
# TODO(synk): ragged threshold-based domain extraction / per-domain mean
# pooling has no clean Pallas equivalent (data-dependent python loop in the
# reference too); it stays host-side.
# --------------------------------------------------------------------------
def extract_domains(boundary_probs, threshold=0.5):
    B, S, _ = boundary_probs.shape
    all_domains = []
    for b in range(B):
        domains = []
        start_probs = boundary_probs[b, :, 0]
        end_probs = boundary_probs[b, :, 1]
        in_domain = False
        current_start = 0
        for i in range(S):
            if (not in_domain) and start_probs[i] > threshold:
                current_start = i
                in_domain = True
            elif in_domain and end_probs[i] > threshold:
                domains.append((current_start, i + 1))
                in_domain = False
        if in_domain:
            domains.append((current_start, S))
        all_domains.append(domains)
    return all_domains


def init_params(key):
    ks = jax.random.split(key, 22)
    def w(k, shape, scale=0.05):
        return jax.random.normal(k, shape, jnp.float32) * scale
    H, F = HIDDEN_DIM, FEATURE_DIM
    return {
        'conv1_w': w(ks[0], (9, F, H)),       'conv1_b': w(ks[1], (1, H)),
        'conv2_w': w(ks[2], (5, H, H // 2)),  'conv2_b': w(ks[3], (1, H // 2)),
        'conv3_w': w(ks[4], (3, H // 2, 2)),  'conv3_b': w(ks[5], (1, 2)),
        'cls_w1':  w(ks[6], (F, H)),          'cls_b1':  w(ks[7], (1, H)),
        'cls_w2':  w(ks[8], (H, NUM_DOMAIN_TYPES)),
        'cls_b2':  w(ks[9], (1, NUM_DOMAIN_TYPES)),
        'site_w1': w(ks[10], (F, H)),         'site_b1': w(ks[11], (1, H)),
        'site_w2': w(ks[12], (H, 5)),         'site_b2': w(ks[13], (1, 5)),
        'attn_wq': w(ks[14], (H, H)),         'attn_wk': w(ks[15], (H, H)),
        'attn_wv': w(ks[16], (H, H)),         'attn_bq': w(ks[17], (1, H)),
        'attn_bk': w(ks[18], (1, H)),         'attn_bv': w(ks[19], (1, H)),
        'attn_wo': w(ks[20], (H, H)),         'attn_bo': w(ks[21], (1, H)),
    }


def domain_function_mapper_forward(features, packed):
    B, S, F = features.shape
    dmax = _dmax_bucket(S)                      # static bucket -> one compile

    # device program #1: boundary probs + functional sites
    boundary_probs, functional_sites = _boundary_sites_jit(
        features, packed['W_A'], packed['W_B'], packed['W_C'],
        packed['bias_row'])

    # single host sync (probs for extraction + features for pooling)
    bp_np, feats_np = jax.device_get((boundary_probs, features))
    bp_np = np.asarray(bp_np)
    feats_np = np.asarray(feats_np)
    domains = extract_domains(bp_np, threshold=0.5)

    # per-domain mean features (ragged, host-side)
    domain_features_list = []
    for b in range(B):
        feats_b = [feats_np[b, s:e].mean(axis=0) for (s, e) in domains[b]]
        if feats_b:
            domain_features_list.append(np.stack(feats_b).astype(np.float32))
        else:
            domain_features_list.append(np.zeros((1, F), np.float32))

    max_d = max(len(df) for df in domain_features_list)     # actual, 1..dmax
    padded = np.zeros((B, dmax, F), np.float32)
    for b, df in enumerate(domain_features_list):
        padded[b, :len(df)] = df

    # device program #2: classifier logits + domain-interaction attention
    interactions_full, dom_logits_full = _interactions_jit(
        jnp.asarray(padded), jnp.asarray([max_d], dtype=jnp.int32),
        packed['cls_w1'], packed['cls_b1'], packed['W_hc'], packed['b_hc'],
        packed['attn_wo'], packed['attn_bo'])

    dom_logits_np = np.asarray(jax.device_get(dom_logits_full))
    domain_predictions = []
    for b in range(B):
        seq_domains = []
        for j, (s, e) in enumerate(domains[b]):
            logits = dom_logits_np[b, j]
            ex = np.exp(logits - logits.max())
            seq_domains.append({'start': s, 'end': e,
                                'class_probs': ex / ex.sum(),
                                'class': int(np.argmax(logits))})
        domain_predictions.append(seq_domains)

    # trim the bucket padding back to the reference's [B, max_d, H] shape
    interactions = interactions_full[:, :max_d, :]

    return {
        'boundary_probabilities': boundary_probs,
        'domains': domain_predictions,
        'functional_sites': functional_sites,
        'domain_interactions': interactions,
        'active_sites': functional_sites[:, :, 0],
        'binding_sites': functional_sites[:, :, 1],
        'catalytic_sites': functional_sites[:, :, 4],
    }


if __name__ == "__main__":
    key = jax.random.PRNGKey(0)
    pkey, xkey = jax.random.split(key)
    params = init_params(pkey)
    packed = pack_params(params)
    features = jax.random.normal(xkey, (BATCH, SEQ, FEATURE_DIM), jnp.float32)

    out = domain_function_mapper_forward(features, packed)
    jax.block_until_ready(out['boundary_probabilities'])
    jax.block_until_ready(out['functional_sites'])
    jax.block_until_ready(out['domain_interactions'])

    # second call exercises the cached (bucketed) compiles — no recompilation
    out = domain_function_mapper_forward(features, packed)
    jax.block_until_ready(out['domain_interactions'])
    print("KERNEL_OK")
</pallas_src>

<mosaic_0001>
module attributes {stable_mosaic.version = 11 : i64} {
  func.func @kernel(%arg0: i32, %arg1: memref<32x288xf32, #tpu.memory_space<vmem>>, %arg2: memref<288x64xf32, #tpu.memory_space<vmem>>, %arg3: memref<64x85xf32, #tpu.memory_space<vmem>>, %arg4: memref<16x6xf32, #tpu.memory_space<vmem>>, %arg5: memref<1x128xf32, #tpu.memory_space<vmem>>, %arg6: memref<32x128xf32, #tpu.memory_space<vmem>>) attributes {dimension_semantics = [#tpu.dimension_semantics<arbitrary>], iteration_bounds = array<i64: 1>, scalar_prefetch = 0 : i64, scratch_operands = 0 : i64, tpu.core_type = #tpu.core_type<tc>, window_params = [{pipeline_mode = #tpu.pipeline_mode<synchronous>, transform_indices = @transform_0, window_bounds = array<i64: 32, 288>}, {pipeline_mode = #tpu.pipeline_mode<synchronous>, transform_indices = @transform_1, window_bounds = array<i64: 288, 64>}, {pipeline_mode = #tpu.pipeline_mode<synchronous>, transform_indices = @transform_2, window_bounds = array<i64: 64, 85>}, {pipeline_mode = #tpu.pipeline_mode<synchronous>, transform_indices = @transform_3, window_bounds = array<i64: 16, 6>}, {pipeline_mode = #tpu.pipeline_mode<synchronous>, transform_indices = @transform_4, window_bounds = array<i64: 1, 128>}, {pipeline_mode = #tpu.pipeline_mode<synchronous>, transform_indices = @transform_5, window_bounds = array<i64: 32, 128>}]} {
    %0 = tpu.iota {dimensions = array<i32: 0>} : vector<32x1xi32>
    %c15_i32 = arith.constant 15 : i32
    %1 = vector.broadcast %c15_i32 : i32 to vector<32x1xi32>
    %2 = arith.andi %0, %1 : vector<32x1xi32>
    %c0 = arith.constant 0 : index
    %c0_0 = arith.constant 0 : index
    %3 = vector.load %arg5[%c0, %c0_0] : memref<1x128xf32, #tpu.memory_space<vmem>>, vector<1x128xf32>
    %4 = vector.extract_strided_slice %3 {offsets = [0, 0], sizes = [1, 64], strides = [1, 1]} : vector<1x128xf32> to vector<1x64xf32>
    %5 = vector.extract_strided_slice %3 {offsets = [0, 64], sizes = [1, 16], strides = [1, 1]} : vector<1x128xf32> to vector<1x16xf32>
    %6 = vector.extract_strided_slice %3 {offsets = [0, 80], sizes = [1, 2], strides = [1, 1]} : vector<1x128xf32> to vector<1x2xf32>
    %7 = vector.extract_strided_slice %3 {offsets = [0, 82], sizes = [1, 5], strides = [1, 1]} : vector<1x128xf32> to vector<1x5xf32>
    %c0_1 = arith.constant 0 : index
    %c0_2 = arith.constant 0 : index
    %8 = vector.load %arg1[%c0_1, %c0_2] : memref<32x288xf32, #tpu.memory_space<vmem>>, vector<32x288xf32>
    %c0_3 = arith.constant 0 : index
    %c0_4 = arith.constant 0 : index
    %9 = vector.load %arg2[%c0_3, %c0_4] : memref<288x64xf32, #tpu.memory_space<vmem>>, vector<288x64xf32>
    %cst = arith.constant dense<0.000000e+00> : vector<32x64xf32>
    %10 = tpu.matmul %8, %9, %cst {dimension_numbers = #tpu.dot_dimension_numbers<[1], [0], [0], [1], [0, 0, 1, 1], [], []>} : vector<32x288xf32>, vector<288x64xf32>, vector<32x64xf32> -> vector<32x64xf32>
    %11 = vector.broadcast %4 : vector<1x64xf32> to vector<32x64xf32>
    %12 = arith.addf %10, %11 : vector<32x64xf32>
    %cst_5 = arith.constant 0.000000e+00 : f32
    %13 = vector.broadcast %cst_5 : f32 to vector<32x64xf32>
    %14 = arith.maximumf %12, %13 : vector<32x64xf32>
    %c0_6 = arith.constant 0 : index
    %c0_7 = arith.constant 0 : index
    %15 = vector.load %arg3[%c0_6, %c0_7] : memref<64x85xf32, #tpu.memory_space<vmem>>, vector<64x85xf32>
    %cst_8 = arith.constant dense<0.000000e+00> : vector<32x85xf32>
    %16 = tpu.matmul %14, %15, %cst_8 {dimension_numbers = #tpu.dot_dimension_numbers<[1], [0], [0], [1], [0, 0, 1, 1], [], []>} : vector<32x64xf32>, vector<64x85xf32>, vector<32x85xf32> -> vector<32x85xf32>
    %17 = vector.extract_strided_slice %16 {offsets = [0, 0], sizes = [32, 16], strides = [1, 1]} : vector<32x85xf32> to vector<32x16xf32>
    %18 = vector.extract_strided_slice %17 {offsets = [30, 0], sizes = [2, 16], strides = [1, 1]} : vector<32x16xf32> to vector<2x16xf32>
    %19 = vector.extract_strided_slice %17 {offsets = [0, 0], sizes = [30, 16], strides = [1, 1]} : vector<32x16xf32> to vector<30x16xf32>
    %20 = tpu.concatenate %18, %19 in 0 : vector<2x16xf32>, vector<30x16xf32> -> vector<32x16xf32>
    %c-2_i32 = arith.constant -2 : i32
    %21 = vector.broadcast %c-2_i32 : i32 to vector<32x1xi32>
    %22 = arith.addi %2, %21 : vector<32x1xi32>
    %c0_i32 = arith.constant 0 : i32
    %23 = vector.broadcast %c0_i32 : i32 to vector<32x1xi32>
    %24 = arith.cmpi sge, %22, %23 : vector<32x1xi32>
    %c-2_i32_9 = arith.constant -2 : i32
    %25 = vector.broadcast %c-2_i32_9 : i32 to vector<32x1xi32>
    %26 = arith.addi %2, %25 : vector<32x1xi32>
    %c16_i32 = arith.constant 16 : i32
    %27 = vector.broadcast %c16_i32 : i32 to vector<32x1xi32>
    %28 = arith.cmpi slt, %26, %27 : vector<32x1xi32>
    %29 = arith.andi %24, %28 : vector<32x1xi1>
    %cst_10 = arith.constant 0.000000e+00 : f32
    %30 = vector.shape_cast %29 : vector<32x1xi1> to vector<32x1xi1>
    %31 = vector.broadcast %30 : vector<32x1xi1> to vector<32x16xi1>
    %32 = vector.broadcast %cst_10 : f32 to vector<32x16xf32>
    %33 = arith.select %31, %20, %32 : vector<32x16xi1>, vector<32x16xf32>
    %34 = vector.extract_strided_slice %16 {offsets = [0, 16], sizes = [32, 16], strides = [1, 1]} : vector<32x85xf32> to vector<32x16xf32>
    %35 = vector.extract_strided_slice %34 {offsets = [31, 0], sizes = [1, 16], strides = [1, 1]} : vector<32x16xf32> to vector<1x16xf32>
    %36 = vector.extract_strided_slice %34 {offsets = [0, 0], sizes = [31, 16], strides = [1, 1]} : vector<32x16xf32> to vector<31x16xf32>
    %37 = tpu.concatenate %35, %36 in 0 : vector<1x16xf32>, vector<31x16xf32> -> vector<32x16xf32>
    %c-1_i32 = arith.constant -1 : i32
    %38 = vector.broadcast %c-1_i32 : i32 to vector<32x1xi32>
    %39 = arith.addi %2, %38 : vector<32x1xi32>
    %c0_i32_11 = arith.constant 0 : i32
    %40 = vector.broadcast %c0_i32_11 : i32 to vector<32x1xi32>
    %41 = arith.cmpi sge, %39, %40 : vector<32x1xi32>
    %c-1_i32_12 = arith.constant -1 : i32
    %42 = vector.broadcast %c-1_i32_12 : i32 to vector<32x1xi32>
    %43 = arith.addi %2, %42 : vector<32x1xi32>
    %c16_i32_13 = arith.constant 16 : i32
    %44 = vector.broadcast %c16_i32_13 : i32 to vector<32x1xi32>
    %45 = arith.cmpi slt, %43, %44 : vector<32x1xi32>
    %46 = arith.andi %41, %45 : vector<32x1xi1>
    %cst_14 = arith.constant 0.000000e+00 : f32
    %47 = vector.shape_cast %46 : vector<32x1xi1> to vector<32x1xi1>
    %48 = vector.broadcast %47 : vector<32x1xi1> to vector<32x16xi1>
    %49 = vector.broadcast %cst_14 : f32 to vector<32x16xf32>
    %50 = arith.select %48, %37, %49 : vector<32x16xi1>, vector<32x16xf32>
    %51 = arith.addf %33, %50 : vector<32x16xf32>
    %52 = vector.extract_strided_slice %16 {offsets = [0, 32], sizes = [32, 16], strides = [1, 1]} : vector<32x85xf32> to vector<32x16xf32>
    %53 = arith.addf %51, %52 : vector<32x16xf32>
    %54 = vector.extract_strided_slice %16 {offsets = [0, 48], sizes = [32, 16], strides = [1, 1]} : vector<32x85xf32> to vector<32x16xf32>
    %55 = vector.extract_strided_slice %54 {offsets = [1, 0], sizes = [31, 16], strides = [1, 1]} : vector<32x16xf32> to vector<31x16xf32>
    %56 = vector.extract_strided_slice %54 {offsets = [0, 0], sizes = [1, 16], strides = [1, 1]} : vector<32x16xf32> to vector<1x16xf32>
    %57 = tpu.concatenate %55, %56 in 0 : vector<31x16xf32>, vector<1x16xf32> -> vector<32x16xf32>
    %c1_i32 = arith.constant 1 : i32
    %58 = vector.broadcast %c1_i32 : i32 to vector<32x1xi32>
    %59 = arith.addi %2, %58 : vector<32x1xi32>
    %c0_i32_15 = arith.constant 0 : i32
    %60 = vector.broadcast %c0_i32_15 : i32 to vector<32x1xi32>
    %61 = arith.cmpi sge, %59, %60 : vector<32x1xi32>
    %c1_i32_16 = arith.constant 1 : i32
    %62 = vector.broadcast %c1_i32_16 : i32 to vector<32x1xi32>
    %63 = arith.addi %2, %62 : vector<32x1xi32>
    %c16_i32_17 = arith.constant 16 : i32
    %64 = vector.broadcast %c16_i32_17 : i32 to vector<32x1xi32>
    %65 = arith.cmpi slt, %63, %64 : vector<32x1xi32>
    %66 = arith.andi %61, %65 : vector<32x1xi1>
    %cst_18 = arith.constant 0.000000e+00 : f32
    %67 = vector.shape_cast %66 : vector<32x1xi1> to vector<32x1xi1>
    %68 = vector.broadcast %67 : vector<32x1xi1> to vector<32x16xi1>
    %69 = vector.broadcast %cst_18 : f32 to vector<32x16xf32>
    %70 = arith.select %68, %57, %69 : vector<32x16xi1>, vector<32x16xf32>
    %71 = arith.addf %53, %70 : vector<32x16xf32>
    %72 = vector.extract_strided_slice %16 {offsets = [0, 64], sizes = [32, 16], strides = [1, 1]} : vector<32x85xf32> to vector<32x16xf32>
    %73 = vector.extract_strided_slice %72 {offsets = [2, 0], sizes = [30, 16], strides = [1, 1]} : vector<32x16xf32> to vector<30x16xf32>
    %74 = vector.extract_strided_slice %72 {offsets = [0, 0], sizes = [2, 16], strides = [1, 1]} : vector<32x16xf32> to vector<2x16xf32>
    %75 = tpu.concatenate %73, %74 in 0 : vector<30x16xf32>, vector<2x16xf32> -> vector<32x16xf32>
    %c2_i32 = arith.constant 2 : i32
    %76 = vector.broadcast %c2_i32 : i32 to vector<32x1xi32>
    %77 = arith.addi %2, %76 : vector<32x1xi32>
    %c0_i32_19 = arith.constant 0 : i32
    %78 = vector.broadcast %c0_i32_19 : i32 to vector<32x1xi32>
    %79 = arith.cmpi sge, %77, %78 : vector<32x1xi32>
    %c2_i32_20 = arith.constant 2 : i32
    %80 = vector.broadcast %c2_i32_20 : i32 to vector<32x1xi32>
    %81 = arith.addi %2, %80 : vector<32x1xi32>
    %c16_i32_21 = arith.constant 16 : i32
    %82 = vector.broadcast %c16_i32_21 : i32 to vector<32x1xi32>
    %83 = arith.cmpi slt, %81, %82 : vector<32x1xi32>
    %84 = arith.andi %79, %83 : vector<32x1xi1>
    %cst_22 = arith.constant 0.000000e+00 : f32
    %85 = vector.shape_cast %84 : vector<32x1xi1> to vector<32x1xi1>
    %86 = vector.broadcast %85 : vector<32x1xi1> to vector<32x16xi1>
    %87 = vector.broadcast %cst_22 : f32 to vector<32x16xf32>
    %88 = arith.select %86, %75, %87 : vector<32x16xi1>, vector<32x16xf32>
    %89 = arith.addf %71, %88 : vector<32x16xf32>
    %90 = vector.broadcast %5 : vector<1x16xf32> to vector<32x16xf32>
    %91 = arith.addf %89, %90 : vector<32x16xf32>
    %cst_23 = arith.constant 0.000000e+00 : f32
    %92 = vector.broadcast %cst_23 : f32 to vector<32x16xf32>
    %93 = arith.maximumf %91, %92 : vector<32x16xf32>
    %c0_24 = arith.constant 0 : index
    %c0_25 = arith.constant 0 : index
    %94 = vector.load %arg4[%c0_24, %c0_25] : memref<16x6xf32, #tpu.memory_space<vmem>>, vector<16x6xf32>
    %cst_26 = arith.constant dense<0.000000e+00> : vector<32x6xf32>
    %95 = tpu.matmul %93, %94, %cst_26 {dimension_numbers = #tpu.dot_dimension_numbers<[1], [0], [0], [1], [0, 0, 1, 1], [], []>} : vector<32x16xf32>, vector<16x6xf32>, vector<32x6xf32> -> vector<32x6xf32>
    %96 = vector.extract_strided_slice %95 {offsets = [0, 0], sizes = [32, 2], strides = [1, 1]} : vector<32x6xf32> to vector<32x2xf32>
    %97 = vector.extract_strided_slice %96 {offsets = [31, 0], sizes = [1, 2], strides = [1, 1]} : vector<32x2xf32> to vector<1x2xf32>
    %98 = vector.extract_strided_slice %96 {offsets = [0, 0], sizes = [31, 2], strides = [1, 1]} : vector<32x2xf32> to vector<31x2xf32>
    %99 = tpu.concatenate %97, %98 in 0 : vector<1x2xf32>, vector<31x2xf32> -> vector<32x2xf32>
    %c-1_i32_27 = arith.constant -1 : i32
    %100 = vector.broadcast %c-1_i32_27 : i32 to vector<32x1xi32>
    %101 = arith.addi %2, %100 : vector<32x1xi32>
    %c0_i32_28 = arith.constant 0 : i32
    %102 = vector.broadcast %c0_i32_28 : i32 to vector<32x1xi32>
    %103 = arith.cmpi sge, %101, %102 : vector<32x1xi32>
    %c-1_i32_29 = arith.constant -1 : i32
    %104 = vector.broadcast %c-1_i32_29 : i32 to vector<32x1xi32>
    %105 = arith.addi %2, %104 : vector<32x1xi32>
    %c16_i32_30 = arith.constant 16 : i32
    %106 = vector.broadcast %c16_i32_30 : i32 to vector<32x1xi32>
    %107 = arith.cmpi slt, %105, %106 : vector<32x1xi32>
    %108 = arith.andi %103, %107 : vector<32x1xi1>
    %cst_31 = arith.constant 0.000000e+00 : f32
    %109 = vector.shape_cast %108 : vector<32x1xi1> to vector<32x1xi1>
    %110 = vector.broadcast %109 : vector<32x1xi1> to vector<32x2xi1>
    %111 = vector.broadcast %cst_31 : f32 to vector<32x2xf32>
    %112 = arith.select %110, %99, %111 : vector<32x2xi1>, vector<32x2xf32>
    %113 = vector.extract_strided_slice %95 {offsets = [0, 2], sizes = [32, 2], strides = [1, 1]} : vector<32x6xf32> to vector<32x2xf32>
    %114 = arith.addf %112, %113 : vector<32x2xf32>
    %115 = vector.extract_strided_slice %95 {offsets = [0, 4], sizes = [32, 2], strides = [1, 1]} : vector<32x6xf32> to vector<32x2xf32>
    %116 = vector.extract_strided_slice %115 {offsets = [1, 0], sizes = [31, 2], strides = [1, 1]} : vector<32x2xf32> to vector<31x2xf32>
    %117 = vector.extract_strided_slice %115 {offsets = [0, 0], sizes = [1, 2], strides = [1, 1]} : vector<32x2xf32> to vector<1x2xf32>
    %118 = tpu.concatenate %116, %117 in 0 : vector<31x2xf32>, vector<1x2xf32> -> vector<32x2xf32>
    %c1_i32_32 = arith.constant 1 : i32
    %119 = vector.broadcast %c1_i32_32 : i32 to vector<32x1xi32>
    %120 = arith.addi %2, %119 : vector<32x1xi32>
    %c0_i32_33 = arith.constant 0 : i32
    %121 = vector.broadcast %c0_i32_33 : i32 to vector<32x1xi32>
    %122 = arith.cmpi sge, %120, %121 : vector<32x1xi32>
    %c1_i32_34 = arith.constant 1 : i32
    %123 = vector.broadcast %c1_i32_34 : i32 to vector<32x1xi32>
    %124 = arith.addi %2, %123 : vector<32x1xi32>
    %c16_i32_35 = arith.constant 16 : i32
    %125 = vector.broadcast %c16_i32_35 : i32 to vector<32x1xi32>
    %126 = arith.cmpi slt, %124, %125 : vector<32x1xi32>
    %127 = arith.andi %122, %126 : vector<32x1xi1>
    %cst_36 = arith.constant 0.000000e+00 : f32
    %128 = vector.shape_cast %127 : vector<32x1xi1> to vector<32x1xi1>
    %129 = vector.broadcast %128 : vector<32x1xi1> to vector<32x2xi1>
    %130 = vector.broadcast %cst_36 : f32 to vector<32x2xf32>
    %131 = arith.select %129, %118, %130 : vector<32x2xi1>, vector<32x2xf32>
    %132 = arith.addf %114, %131 : vector<32x2xf32>
    %133 = vector.broadcast %6 : vector<1x2xf32> to vector<32x2xf32>
    %134 = arith.addf %132, %133 : vector<32x2xf32>
    %135 = vector.extract_strided_slice %134 {offsets = [0, 0], sizes = [32, 1], strides = [1, 1]} : vector<32x2xf32> to vector<32x1xf32>
    %136 = vector.extract_strided_slice %134 {offsets = [0, 1], sizes = [32, 1], strides = [1, 1]} : vector<32x2xf32> to vector<32x1xf32>
    %137 = arith.subf %135, %136 : vector<32x1xf32>
    %138 = math.absf %137 : vector<32x1xf32>
    %cst_37 = arith.constant 0.000000e+00 : f32
    %139 = vector.broadcast %cst_37 : f32 to vector<32x1xf32>
    %140 = arith.subf %139, %138 : vector<32x1xf32>
    %141 = math.exp %140 : vector<32x1xf32>
    %cst_38 = arith.constant 1.000000e+00 : f32
    %142 = vector.broadcast %cst_38 : f32 to vector<32x1xf32>
    %143 = arith.addf %142, %141 : vector<32x1xf32>
    %144 = arith.divf %141, %143 : vector<32x1xf32>
    %cst_39 = arith.constant 1.000000e+00 : f32
    %145 = vector.broadcast %cst_39 : f32 to vector<32x1xf32>
    %146 = arith.addf %145, %141 : vector<32x1xf32>
    %cst_40 = arith.constant 1.000000e+00 : f32
    %147 = vector.broadcast %cst_40 : f32 to vector<32x1xf32>
    %148 = arith.divf %147, %146 : vector<32x1xf32>
    %cst_41 = arith.constant 0.000000e+00 : f32
    %149 = vector.broadcast %cst_41 : f32 to vector<32x1xf32>
    %150 = arith.cmpf oge, %137, %149 : vector<32x1xf32>
    %151 = arith.select %150, %148, %144 : vector<32x1xi1>, vector<32x1xf32>
    %cst_42 = arith.constant 0.000000e+00 : f32
    %152 = vector.broadcast %cst_42 : f32 to vector<32x1xf32>
    %153 = arith.cmpf oge, %137, %152 : vector<32x1xf32>
    %154 = arith.select %153, %144, %148 : vector<32x1xi1>, vector<32x1xf32>
    %155 = vector.extract_strided_slice %16 {offsets = [0, 80], sizes = [32, 5], strides = [1, 1]} : vector<32x85xf32> to vector<32x5xf32>
    %156 = vector.broadcast %7 : vector<1x5xf32> to vector<32x5xf32>
    %157 = arith.addf %155, %156 : vector<32x5xf32>
    %158 = math.absf %157 : vector<32x5xf32>
    %cst_43 = arith.constant 0.000000e+00 : f32
    %159 = vector.broadcast %cst_43 : f32 to vector<32x5xf32>
    %160 = arith.subf %159, %158 : vector<32x5xf32>
    %161 = math.exp %160 : vector<32x5xf32>
    %cst_44 = arith.constant 0.000000e+00 : f32
    %162 = vector.broadcast %cst_44 : f32 to vector<32x5xf32>
    %163 = arith.cmpf oge, %157, %162 : vector<32x5xf32>
    %cst_45 = arith.constant 1.000000e+00 : f32
    %164 = vector.broadcast %cst_45 : f32 to vector<32x5xf32>
    %165 = arith.addf %164, %161 : vector<32x5xf32>
    %cst_46 = arith.constant 1.000000e+00 : f32
    %166 = vector.broadcast %cst_46 : f32 to vector<32x5xf32>
    %167 = arith.divf %166, %165 : vector<32x5xf32>
    %cst_47 = arith.constant 1.000000e+00 : f32
    %168 = vector.broadcast %cst_47 : f32 to vector<32x5xf32>
    %169 = arith.addf %168, %161 : vector<32x5xf32>
    %170 = arith.divf %161, %169 : vector<32x5xf32>
    %171 = arith.select %163, %167, %170 : vector<32x5xi1>, vector<32x5xf32>
    %cst_48 = arith.constant 0.000000e+00 : f32
    %172 = vector.broadcast %cst_48 : f32 to vector<32x121xf32>
    %173 = tpu.concatenate %151, %154, %171, %172 in 1 : vector<32x1xf32>, vector<32x1xf32>, vector<32x5xf32>, vector<32x121xf32> -> vector<32x128xf32>
    %c0_49 = arith.constant 0 : index
    %c0_50 = arith.constant 0 : index
    %174 = vector.load %arg6[%c0_49, %c0_50] : memref<32x128xf32, #tpu.memory_space<vmem>>, vector<32x128xf32>
    tpu.vector_store %arg6[%c0_49, %c0_50], %173 {strides = array<i32>} : memref<32x128xf32, #tpu.memory_space<vmem>>, vector<32x128xf32>,
    return
  }
  func.func @transform_0(%arg0: i32) -> (i32, i32) {
    %c0_i32 = arith.constant 0 : i32
    %c0_i32_0 = arith.constant 0 : i32
    %c0_i32_1 = arith.constant 0 : i32
    return %c0_i32, %c0_i32_0 : i32, i32
  }
  func.func @transform_1(%arg0: i32) -> (i32, i32) {
    %c0_i32 = arith.constant 0 : i32
    %c0_i32_0 = arith.constant 0 : i32
    %c0_i32_1 = arith.constant 0 : i32
    return %c0_i32, %c0_i32_0 : i32, i32
  }
  func.func @transform_2(%arg0: i32) -> (i32, i32) {
    %c0_i32 = arith.constant 0 : i32
    %c0_i32_0 = arith.constant 0 : i32
    %c0_i32_1 = arith.constant 0 : i32
    return %c0_i32, %c0_i32_0 : i32, i32
  }
  func.func @transform_3(%arg0: i32) -> (i32, i32) {
    %c0_i32 = arith.constant 0 : i32
    %c0_i32_0 = arith.constant 0 : i32
    %c0_i32_1 = arith.constant 0 : i32
    return %c0_i32, %c0_i32_0 : i32, i32
  }
  func.func @transform_4(%arg0: i32) -> (i32, i32) {
    %c0_i32 = arith.constant 0 : i32
    %c0_i32_0 = arith.constant 0 : i32
    %c0_i32_1 = arith.constant 0 : i32
    return %c0_i32, %c0_i32_0 : i32, i32
  }
  func.func @transform_5(%arg0: i32) -> (i32, i32) {
    %c0_i32 = arith.constant 0 : i32
    %c0_i32_0 = arith.constant 0 : i32
    %c0_i32_1 = arith.constant 0 : i32
    return %c0_i32, %c0_i32_0 : i32, i32
  }
}

</mosaic_0001>

<bundles_post_ra>
// kernel: _boundary_sites_jit.1
= control target key start
LH: loop header
LB: loop body
LE: loop exit
PB: predicated region body
PF: predicated region fallthrough
CT: control target
= control target key end

     0   :  { %vm84_vm0 = vcmask 261120   ;;  %s1214_s30 = smov 64   ;;  %vm279_vm1 = vcmask 523264   ;;  %vm425_vm2 = vcmask 1040384   ;;  %vm501_vm3 = vcmask 1046528   ;;  %s1217_s6 = smov 80   ;;  %s1643_s1 = inlined_call_operand.vmem [shape: f32[288,64], index: 1, kind: input, shape index: {}]   ;;  %s1644_s0 = inlined_call_operand.vmem [shape: f32[32,288], index: 0, kind: input, shape index: {}]   ;;  %s1645_s2 = inlined_call_operand.vmem [shape: f32[64,85], index: 2, kind: input, shape index: {}]   ;;  %s1646_s4 = inlined_call_operand.vmem [shape: f32[1,128], index: 4, kind: input, shape index: {}]   ;;  %s1647_s3 = inlined_call_operand.vmem [shape: f32[16,6], index: 3, kind: input, shape index: {}]   ;;  %s1648_s5 = inlined_call_operand.vmem [shape: f32[32,128], index: 5, kind: output, shape index: {}]  }
   0x1   :  { %v58_v0 = vld [vmem:[%s1643_s1 + $0x80] sm:$0xff]  ;;  %v59_v1 = vld [vmem:[%s1643_s1 + $0x88] sm:$0xff]  ;;  %v60_v5 = vld [vmem:[%s1643_s1 + $0x90] sm:$0xff]  ;;  %vm563_vm4 = vcmask 1045504   ;;  %vm383_vm5 = vcmask 1041408   ;;  %vm638_vm14 = vcmask 130048  }
   0x2   :  { %v42_v2 = vld [vmem:[%s1643_s1] sm:$0xff]  ;;  %v1112_v3 = vpack.c.bf16 %v59_v1, %v58_v0  ;;  %v43_v4 = vld [vmem:[%s1643_s1 + $0x8] sm:$0xff]  ;;  %v61_v6 = vld [vmem:[%s1643_s1 + $0x98] sm:$0xff]  ;;  %s1219_s10 = smov 124   ;;  %s1220_s11 = smov 48  }
   0x3   :  { %v1114_v7 = vpack.c.bf16 %v43_v4, %v42_v2  ;;  %v1116_v8 = vpack.c.bf16 %v61_v6, %v60_v5  ;;  %v44_v9 = vld [vmem:[%s1643_s1 + $0x10] sm:$0xff]  ;;  %v45_v10 = vld [vmem:[%s1643_s1 + $0x18] sm:$0xff]  ;;  %v62_v11 = vld [vmem:[%s1643_s1 + $0xa0] sm:$0xff]  ;;  %s1221_s12 = smov 127   ;;  %s1222_s13 = smov 50  }
   0x4   :  { %1113 = vmatprep.subr.bf16.mxu0 %v1112_v3  ;;  %v63_v12 = vld [vmem:[%s1643_s1 + $0xa8] sm:$0xff]  ;;  %v1118_v13 = vpack.c.bf16 %v45_v10, %v44_v9  ;;  %v46_v15 = vld [vmem:[%s1643_s1 + $0x20] sm:$0xff]  ;;  %v64_v17 = vld [vmem:[%s1643_s1 + $0xb0] sm:$0xff]  ;;  %s1223_s14 = smov 1  }
   0x5   :  { %1115 = vmatpush3.bf16.msra.mxu0 %v1114_v7  ;;  %v1120_v14 = vpack.c.bf16 %v63_v12, %v62_v11  ;;  %v47_v16 = vld [vmem:[%s1643_s1 + $0x28] sm:$0xff]  ;;  %v65_v18 = vld [vmem:[%s1643_s1 + $0xb8] sm:$0xff]  ;;  %v48_v21 = vld [vmem:[%s1643_s1 + $0x30] sm:$0xff] }
   0x6   :  { %1117 = vmatprep.subr.bf16.mxu0 %v1116_v8  ;;  %v1122_v19 = vpack.c.bf16 %v47_v16, %v46_v15  ;;  %v1124_v20 = vpack.c.bf16 %v65_v18, %v64_v17  ;;  %v49_v22 = vld [vmem:[%s1643_s1 + $0x38] sm:$0xff]  ;;  %v66_v23 = vld [vmem:[%s1643_s1 + $0xc0] sm:$0xff]  ;;  %v67_v24 = vld [vmem:[%s1643_s1 + $0xc8] sm:$0xff] }
   0x7   :  { %v74_v25 = vld [vmem:[%s1643_s1 + $0x100] sm:$0xff]  ;;  %v75_v26 = vld [vmem:[%s1643_s1 + $0x108] sm:$0xff]  ;;  %v1126_v29 = vpack.c.bf16 %v49_v22, %v48_v21  ;;  %v76_v30 = vld [vmem:[%s1643_s1 + $0x110] sm:$0xff]  ;;  %v1128_v32 = vpack.c.bf16 %v67_v24, %v66_v23 }
   0x8   :  { %v1144_v27 = vpack.c.bf16 %v75_v26, %v74_v25  ;;  %v31_v28 = vld [vmem:[%s1644_s0 + $0x8] sm:$0xff]  ;;  %v77_v31 = vld [vmem:[%s1643_s1 + $0x118] sm:$0xff]  ;;  %v50_v33 = vld [vmem:[%s1643_s1 + $0x40] sm:$0xff] }
   0x9   :  { %1119 = vmatpush3.bf16.msra.mxu0 %v1118_v13  ;;  %161 = vmatprep.mubr.f32.mxu0 %v31_v28  ;;  %v51_v34 = vld [vmem:[%s1643_s1 + $0x48] sm:$0xff]  ;;  %v1148_v35 = vpack.c.bf16 %v77_v31, %v76_v30  ;;  %v32_v36 = vld [vmem:[%s1644_s0 + $0x10] sm:$0xff]  ;;  %v69_v38 = vld [vmem:[%s1643_s1 + $0xd8] sm:$0xff] }
   0xa   :  { %1121 = vmatprep.subr.bf16.mxu0 %v1120_v14  ;;  %1145 = vmatprep.subr.bf16.mxu1 %v1144_v27  ;;  %v68_v37 = vld [vmem:[%s1643_s1 + $0xd0] sm:$0xff]  ;;  %v1130_v39 = vpack.c.bf16 %v51_v34, %v50_v33  ;;  %v271_v40 = vld [vmem:[%s1645_s2] sm:$0xff]  ;;  %v272_v41 = vld [vmem:[%s1645_s2 + $0x8] sm:$0xff] }
   0xb   :  { %1147 = vmatpush3.bf16.msra.mxu1 %v1144_v27  ;;  %1074 = vmatprep.mubr.msk.f32.mxu1 %vm84_vm0, %v32_v36  ;;  %v1132_v42 = vpack.c.bf16 %v69_v38, %v68_v37  ;;  %v52_v43 = vld [vmem:[%s1643_s1 + $0x50] sm:$0xff]  ;;  %v53_v44 = vld [vmem:[%s1643_s1 + $0x58] sm:$0xff]  ;;  %v1152_v45 = vpack.c.bf16 %v272_v41, %v271_v40  ;;  %v70_v46 = vld [vmem:[%s1643_s1 + $0xe0] sm:$0xff] }
   0xc   :  { %1149 = vmatprep.subr.bf16.mxu1 %v1148_v35  ;;  %v71_v47 = vld [vmem:[%s1643_s1 + $0xe8] sm:$0xff]  ;;  %v38_v49 = vld [vmem:[%s1644_s0 + $0x40] sm:$0xff]  ;;  %v1134_v50 = vpack.c.bf16 %v53_v44, %v52_v43  ;;  %v72_v54 = vld [vmem:[%s1643_s1 + $0xf0] sm:$0xff]  ;;  %v20_v43 = vlaneseq }
   0xd   :  { %1123 = vmatpush3.bf16.msra.mxu0 %v1122_v19  ;;  %v35_v48 = vld [vmem:[%s1644_s0 + $0x28] sm:$0xff]  ;;  %v1136_v51 = vpack.c.bf16 %v71_v47, %v70_v46  ;;  %v54_v52 = vld [vmem:[%s1643_s1 + $0x60] sm:$0xff]  ;;  %v73_v55 = vld [vmem:[%s1643_s1 + $0xf8] sm:$0xff] }
   0xe   :  { %1125 = vmatprep.subr.bf16.mxu0 %v1124_v20  ;;  %v55_v53 = vld [vmem:[%s1643_s1 + $0x68] sm:$0xff]  ;;  %v41_v56 = vld [vmem:[%s1644_s0 + $0x58] sm:$0xff]  ;;  %v1140_v58 = vpack.c.bf16 %v73_v55, %v72_v54  ;;  %v56_v59 = vld [vmem:[%s1643_s1 + $0x70] sm:$0xff]  ;;  %v1441_v44 = vshrl.u32 %v20_v43, 7 }
   0xf   :  { %1151 = vmatpush3.bf16.msra.mxu1 %v1148_v35  ;;  %v1138_v57 = vpack.c.bf16 %v55_v53, %v54_v52  ;;  %v57_v60 = vld [vmem:[%s1643_s1 + $0x78] sm:$0xff]  ;;  %v30_v62 = vld [vmem:[%s1644_s0] sm:$0xff]  ;;  %v36_v2 = vld [vmem:[%s1644_s0 + $0x30] sm:$0xff] }
  0x10   :  { %1153 = vmatprep.subr.bf16.mxu1 %v1152_v45  ;;  %v1142_v61 = vpack.c.bf16 %v57_v60, %v56_v59  ;;  %v34_v63 = vld [vmem:[%s1644_s0 + $0x20] sm:$0xff]  ;;  %v33_v0 = vld [vmem:[%s1644_s0 + $0x18] sm:$0xff]  ;;  %v40_v3 = vld [vmem:[%s1644_s0 + $0x50] sm:$0xff]  ;;  %v22_v46 = vadd.s32 8, %v1441_v44  ;;  %v1446_v47 = vadd.s32 16, %v1441_v44 }
  0x11   :  { %1127 = vmatpush3.bf16.msra.mxu0 %v1126_v29  ;;  %v37_v1 = vld [vmem:[%s1644_s0 + $0x38] sm:$0xff]  ;;  %v39_v4 = vld [vmem:[%s1644_s0 + $0x48] sm:$0xff]  ;;  %v273_v5 = vld [vmem:[%s1645_s2 + $0x10] sm:$0xff] }
  0x12   :  { %1129 = vmatprep.subr.bf16.mxu0 %v1128_v32  ;;  %1075 = vmatmul.mubr.msk.f32.vlgmr.msra.gmra.mrb[0].mxu1 %vm84_vm0, %v35_v48  ;;  %v274_v6 = vld [vmem:[%s1645_s2 + $0x18] sm:$0xff]  ;;  %v275_v8 = vld [vmem:[%s1645_s2 + $0x20] sm:$0xff]  ;;  %v276_v9 = vld [vmem:[%s1645_s2 + $0x28] sm:$0xff]  ;;  %v27_v59 = vand.u32 15, %v1446_v47 }
  0x13   :  { %1077 = vmatprep.mubr.msk.f32.mxu1 %vm84_vm0, %v38_v49  ;;  %1155 = vmatpush3.bf16.msra.mxu1 %v1152_v45  ;;  %v1156_v7 = vpack.c.bf16 %v274_v6, %v273_v5  ;;  %v1160_v10 = vpack.c.bf16 %v276_v9, %v275_v8  ;;  %v277_v11 = vld [vmem:[%s1645_s2 + $0x30] sm:$0xff]  ;;  %v278_v12 = vld [vmem:[%s1645_s2 + $0x38] sm:$0xff]  ;;  %v1429_v14 = vld [vmem:[%s1646_s4] ss:$0 sm:$0xff]  ;;  %v25_v45 = vand.u32 15, %v1441_v44  ;;  %s1215_s2 = smov 96  }
  0x14   :  { %v1164_v13 = vpack.c.bf16 %v278_v12, %v277_v11  ;;  %625 = vrot.lane.b32.xlu1 %v1429_v14, %s1214_s30  ;;  %s1216_s4 = smov 112   ;;  %v397_v5 = vadd.s32 4294967294, %v27_v59 }
  0x15   :  { %1131 = vmatpush3.bf16.msra.mxu0 %v1130_v39  ;;  %1157 = vmatprep.subr.bf16.mxu1 %v1156_v7  ;;  %v395_v60 = vadd.s32 4294967294, %v25_v45 }
  0x16   :  { %1133 = vmatprep.subr.bf16.mxu0 %v1132_v42  ;;  %1078 = vmatmul.mubr.msk.f32.gmra.mrb[2].mxu1 %vm84_vm0, %v41_v56  ;;  %vm401_vm9 = vcmp.ge.s32.totalorder %v397_v5, 0 }
  0x17   :  { %1159 = vmatpush3.bf16.msra.mxu1 %v1156_v7  ;;  %vm399_vm6 = vcmp.ge.s32.totalorder %v395_v60, 0 }
  0x18   :  { %1161 = vmatprep.subr.bf16.mxu1 %v1160_v10 }
  0x19   :  { %1135 = vmatpush3.bf16.msra.mxu0 %v1134_v50 }
  0x1a   :  { %1137 = vmatprep.subr.bf16.mxu0 %v1136_v51 }
  0x1b   :  { %1163 = vmatpush3.bf16.msra.mxu1 %v1160_v10 }
  0x1c   :  { %1165 = vmatprep.subr.bf16.mxu1 %v1164_v13 }
  0x1d   :  { %1139 = vmatpush3.bf16.msra.mxu0 %v1138_v57 }
  0x1e   :  { %1141 = vmatprep.subr.bf16.mxu0 %v1140_v58  ;;  %v26_v58 = vand.u32 15, %v22_v46 }
  0x1f   :  { %1167 = vmatpush3.bf16.msra.mxu1 %v1164_v13 }
  0x21   :  { %1143 = vmatpush3.bf16.msra.mxu0 %v1142_v61 }
  0x24   :  { %162 = vmatmul.mubr.f32.vlgmr.msra.gmra.mrb[0].mxu0 %v30_v62 }
  0x25   :  { %166 = vmatprep.mubr.f32.mxu0 %v34_v63 }
  0x28   :  { %167 = vmatmul.mubr.f32.gmra.mrb[2].mxu0 %v33_v0 }
  0x29   :  { %171 = vmatprep.mubr.f32.mxu0 %v37_v1  ;;  %v1472_v1 = vadd.s32 4294967295, %v25_v45 }
  0x2b   :  { %vm441_vm7 = vcmp.ge.s32.totalorder %v1472_v1, 0 }
  0x2c   :  { %172 = vmatmul.mubr.f32.gmra.mrb[4].mxu0 %v36_v2 }
  0x2d   :  { %176 = vmatprep.mubr.f32.mxu0 %v40_v3  ;;  %v1476_v3 = vadd.s32 1, %v26_v58 }
  0x2f   :  { %vm524_vm8 = vcmp.lt.s32.totalorder %v1476_v3, 16 }
  0x30   :  { %177 = vmatmul.mubr.f32.gmra.mrb[6].mxu0 %v39_v4  ;;  %v578_v4 = vadd.s32 2, %v26_v58 }
  0x32   :  { %vm586_vm10 = vcmp.lt.s32.totalorder %v578_v4, 16 }
  0xe5   :  { %v1076_v15 = vpop.f32.mrb[0].mxu1 }
  0xe6   :  { %v248_v16 = vpop.f32.mrb[1].mxu1 }
  0xe9   :  { %v1079_v17 = vpop.f32.mrb[2].mxu1 }
  0xea   :  { %v258_v18 = vpop.f32.mrb[3].mxu1 }
  0xf7   :  { %v1028_v19 = vpop.f32.mrb[0].mxu0 }
  0xf8   :  { %v1029_v20 = vpop.f32.mrb[1].mxu0 }
  0xf9   :  { %v1030_v21 = vadd.f32 %v1029_v20, %v1028_v19 }
  0xfb   :  { %v1031_v22 = vpop.f32.mrb[2].mxu0  ;;  %v164_v23 = vadd.f32 %v1030_v21, %v1429_v14 }
  0xfc   :  { %v1032_v24 = vpop.f32.mrb[3].mxu0 }
  0xfd   :  { %v1033_v25 = vadd.f32 %v1032_v24, %v1031_v22  ;;  %v249_v26 = vadd.f32 %v248_v16, %v164_v23 }
  0xff   :  { %v169_v27 = vadd.f32 %v1033_v25, %v1429_v14  ;;  %v267_v28 = vmax.f32 %v249_v26, 0.0  ;;  %v1034_v29 = vpop.f32.mrb[4].mxu0  ;;  %v636_v25 = vld [vmem:[%s1647_s3] sm:$0xff]  ;;  %v637_v26 = vld [vmem:[%s1647_s3 + $0x8] sm:$0xff]  ;;  %s1218_s3 = smov 126  }
 0x100   :  { %v1035_v30 = vpop.f32.mrb[5].mxu0 }
 0x101   :  { %v254_v31 = vadd.f32 %v1076_v15, %v169_v27  ;;  %v1036_v32 = vadd.f32 %v1035_v30, %v1034_v29  ;;  %1096 = vmatprep.mubr.msk.f32.mxu1 %vm279_vm1, %v267_v28  ;;  %v1168_v30 = vpack.c.bf16 %v637_v26, %v636_v25 }
 0x103   :  { %v268_v33 = vmax.f32 %v254_v31, 0.0  ;;  %v1037_v34 = vpop.f32.mrb[6].mxu0  ;;  %v174_v35 = vadd.f32 %v1036_v32, %v1429_v14  ;;  %1169 = vmatprep.subr.bf16.mxu1 %v1168_v30 }
 0x104   :  { %v1038_v36 = vpop.f32.mrb[7].mxu0 }
 0x105   :  { %v1039_v37 = vadd.f32 %v1038_v36, %v1037_v34  ;;  %v259_v38 = vadd.f32 %v258_v18, %v174_v35  ;;  %1097 = vmatmul.mubr.msk.f32.vlgmr.msra.gmra.mrb[4].mxu1 %vm279_vm1, %v268_v33  ;;  %v24_v35 = vadd.s32 24, %v1441_v44  ;;  %v626_v44 = vpop.permute.xlu1 %625 }
 0x106   :  { %1171 = vmatpush3.bf16.msra.mxu1 %v1168_v30 }
 0x107   :  { %v179_v39 = vadd.f32 %v1039_v37, %v1429_v14  ;;  %v269_v40 = vmax.f32 %v259_v38, 0.0  ;;  %v1524_v37 = vadd.s32 4294967295, %v27_v59  ;;  %v28_v38 = vand.u32 15, %v24_v35 }
 0x109   :  { %v264_v41 = vadd.f32 %v1079_v17, %v179_v39  ;;  %1099 = vmatprep.mubr.msk.f32.mxu1 %vm279_vm1, %v269_v40  ;;  %vm443_vm11 = vcmp.ge.s32.totalorder %v1524_v37, 0  ;;  %v1529_v39 = vadd.s32 1, %v28_v38 }
 0x10b   :  { %v270_v42 = vmax.f32 %v264_v41, 0.0  ;;  %vm526_vm12 = vcmp.lt.s32.totalorder %v1529_v39, 16  ;;  %v580_v41 = vadd.s32 2, %v28_v38 }
 0x10d   :  { %1100 = vmatmul.mubr.msk.f32.gmra.mrb[6].mxu1 %vm279_vm1, %v270_v42  ;;  %vm588_vm13 = vcmp.lt.s32.totalorder %v580_v41, 16 }
 0x1d8   :  { %v1448_v48 = vpop.f32.mrb[4].mxu1 }
 0x1d9   :  { %487 = vrot.lane.b32.xlu1 %v1448_v48, %s1215_s2  ;;  %v1452_v49 = vpop.f32.mrb[5].mxu1  ;;  %v427_v50 = vrot.slane %v1448_v48, 7  ;;  %v503_v51 = vrot.slane %v1448_v48, 1  ;;  %v565_v52 = vrot.slane %v1448_v48, 2  ;;  %v385_v53 = vrot.slane %v1448_v48, 6 }
 0x1da   :  { %v426_v54 = vrot.slane %v1452_v49, 7  ;;  %v502_v55 = vrot.slane %v1452_v49, 1  ;;  %v564_v56 = vrot.slane %v1452_v49, 2  ;;  %v384_v57 = vrot.slane %v1452_v49, 6 }
 0x1dc   :  { %v428_v61 = vsel %vm425_vm2, %v426_v54, %v427_v50  ;;  %v504_v62 = vsel %vm501_vm3, %v502_v55, %v503_v51  ;;  %v566_v63 = vsel %vm563_vm4, %v564_v56, %v565_v52  ;;  %v1467_v0 = vsel %vm383_vm5, %v384_v57, %v385_v53 }
 0x1dd   :  { %485 = vrot.lane.b32.xlu1 %v1452_v49, %s1215_s2  ;;  %471 = vrot.lane.b32.xlu0 %v428_v61, %s1216_s4 }
 0x1e0   :  { %v1474_v2 = vpop.f32.mrb[6].mxu1 }
 0x1e1   :  { %547 = vrot.lane.b32.xlu1 %v504_v62, %s1217_s6  ;;  %491 = vrot.lane.b32.xlu0 %v1474_v2, %s1215_s2  ;;  %v1481_v6 = vpop.f32.mrb[7].mxu1  ;;  %v423_v7 = vrot.slane %v1474_v2, 7  ;;  %v569_v8 = vrot.slane %v1474_v2, 2  ;;  %v507_v9 = vrot.slane %v1474_v2, 1  ;;  %v378_v10 = vrot.slane %v1474_v2, 6 }
 0x1e2   :  { %v505_v11 = vrot.slane %v1481_v6, 1  ;;  %v567_v12 = vrot.slane %v1481_v6, 2  ;;  %v429_v13 = vrot.slane %v1481_v6, 7  ;;  %v387_v15 = vrot.slane %v1481_v6, 6 }
 0x1e3   :  { %v436_v16 = vsel %vm425_vm2, %v423_v7, %v426_v54  ;;  %v514_v17 = vsel %vm501_vm3, %v507_v9, %v502_v55  ;;  %v576_v18 = vsel %vm563_vm4, %v569_v8, %v564_v56  ;;  %v394_v19 = vsel %vm383_vm5, %v378_v10, %v384_v57 }
 0x1e4   :  { %v506_v20 = vsel %vm501_vm3, %v503_v51, %v505_v11  ;;  %v568_v21 = vsel %vm563_vm4, %v565_v52, %v567_v12  ;;  %v431_v22 = vsel %vm425_vm2, %v429_v13, %v423_v7  ;;  %v570_v23 = vsel %vm563_vm4, %v567_v12, %v569_v8 }
 0x1e5   :  { %609 = vrot.lane.b32.xlu1 %v566_v63, %s1214_s30  ;;  %489 = vrot.lane.b32.xlu0 %v1481_v6, %s1215_s2  ;;  %v508_v24 = vsel %vm501_vm3, %v505_v11, %v507_v9  ;;  %v430_v27 = vsel %vm425_vm2, %v427_v50, %v429_v13  ;;  %v419_v28 = vsel %vm399_vm6, %v394_v19, 0.0  ;;  %v389_v29 = vsel %vm383_vm5, %v387_v15, %v378_v10 }
 0x1e6   :  { %v388_v31 = vsel %vm383_vm5, %v385_v53, %v387_v15  ;;  %v461_v32 = vsel %vm441_vm7, %v436_v16, 0.0  ;;  %v540_v33 = vsel %vm524_vm8, %v506_v20, 0.0  ;;  %v602_v36 = vsel %vm586_vm10, %v568_v21, 0.0 }
 0x1e7   :  { %v421_v34 = vsel %vm401_vm9, %v388_v31, 0.0  ;;  %v463_v40 = vsel %vm443_vm11, %v430_v27, 0.0  ;;  %v542_v42 = vsel %vm526_vm12, %v514_v17, 0.0  ;;  %v604_v43 = vsel %vm588_vm13, %v576_v18, 0.0 }
 0x1e8   :  { %vm970_vm9 = vcmask 56320  }
 0x1e9   :  { %469 = vrot.lane.b32.xlu0 %v461_v32, %s1216_s4  ;;  %549 = vrot.lane.b32.xlu1 %v540_v33, %s1217_s6 }
 0x1ed   :  { %611 = vrot.lane.b32.xlu1 %v602_v36, %s1214_s30  ;;  %475 = vrot.lane.b32.xlu0 %v431_v22, %s1216_s4 }
 0x1f1   :  { %613 = vrot.lane.b32.xlu1 %v570_v23, %s1214_s30  ;;  %551 = vrot.lane.b32.xlu0 %v508_v24, %s1217_s6 }
 0x1f5   :  { %473 = vrot.lane.b32.xlu0 %v463_v40, %s1216_s4 }
 0x1f9   :  { %553 = vrot.lane.b32.xlu0 %v542_v42, %s1217_s6 }
 0x1fd   :  { %615 = vrot.lane.b32.xlu0 %v604_v43, %s1214_s30 }
 0x24b   :  { %v488_v45 = vpop.permute.xlu1 %487 }
 0x24f   :  { %v486_v46 = vpop.permute.xlu1 %485  ;;  %v472_v47 = vpop.permute.xlu0 %471 }
 0x250   :  { %v482_v54 = vadd.f32 %v472_v47, %v1467_v0 }
 0x252   :  { %v498_v58 = vadd.f32 %v488_v45, %v482_v54 }
 0x253   :  { %v548_v50 = vpop.permute.xlu1 %547  ;;  %v492_v51 = vpop.permute.xlu0 %491 }
 0x257   :  { %v610_v52 = vpop.permute.xlu1 %609  ;;  %v490_v53 = vpop.permute.xlu0 %489 }
 0x25b   :  { %v470_v55 = vpop.permute.xlu0 %469  ;;  %v550_v56 = vpop.permute.xlu1 %549 }
 0x25c   :  { %v481_v57 = vadd.f32 %v470_v55, %v419_v28  ;;  %v560_v60 = vadd.f32 %v550_v56, %v498_v58 }
 0x25e   :  { %v497_v59 = vadd.f32 %v486_v46, %v481_v57 }
 0x25f   :  { %v612_v61 = vpop.permute.xlu1 %611  ;;  %v476_v62 = vpop.permute.xlu0 %475 }
 0x260   :  { %v559_v63 = vadd.f32 %v548_v50, %v497_v59  ;;  %v622_v4 = vadd.f32 %v612_v61, %v560_v60  ;;  %v484_v13 = vadd.f32 %v476_v62, %v389_v29 }
 0x262   :  { %v621_v5 = vadd.f32 %v610_v52, %v559_v63  ;;  %v629_v7 = vadd.f32 %v626_v44, %v622_v4  ;;  %v500_v18 = vadd.f32 %v492_v51, %v484_v13 }
 0x263   :  { %v552_v8 = vpop.permute.xlu0 %551  ;;  %v614_v19 = vpop.permute.xlu1 %613 }
 0x264   :  { %v628_v9 = vadd.f32 %v626_v44, %v621_v5  ;;  %v633_v11 = vmax.f32 %v629_v7, 0.0 }
 0x266   :  { %v632_v10 = vmax.f32 %v628_v9, 0.0 }
 0x267   :  { %v474_v12 = vpop.permute.xlu0 %473 }
 0x268   :  { %v483_v0 = vadd.f32 %v474_v12, %v421_v34  ;;  %1106 = vmatprep.mubr.msk.f32.mxu1 %vm638_vm14, %v632_v10 }
 0x269   :  { %1107 = vmatmul.mubr.msk.f32.vlgmr.msra.gmra.mrb[8].mxu1 %vm638_vm14, %v633_v11 }
 0x26a   :  { %v499_v15 = vadd.f32 %v490_v53, %v483_v0 }
 0x26b   :  { %v554_v16 = vpop.permute.xlu0 %553 }
 0x26c   :  { %v561_v17 = vadd.f32 %v552_v8, %v499_v15  ;;  %v562_v21 = vadd.f32 %v554_v16, %v500_v18 }
 0x26e   :  { %v623_v20 = vadd.f32 %v614_v19, %v561_v17 }
 0x26f   :  { %v616_v22 = vpop.permute.xlu0 %615 }
 0x270   :  { %v624_v23 = vadd.f32 %v616_v22, %v562_v21  ;;  %v630_v24 = vadd.f32 %v626_v44, %v623_v20 }
 0x272   :  { %v631_v25 = vadd.f32 %v626_v44, %v624_v23  ;;  %v634_v26 = vmax.f32 %v630_v24, 0.0 }
 0x274   :  { %v635_v27 = vmax.f32 %v631_v25, 0.0  ;;  %1109 = vmatprep.mubr.msk.f32.mxu1 %vm638_vm14, %v634_v26 }
 0x276   :  { %1110 = vmatmul.mubr.msk.f32.gmra.mrb[10].mxu1 %vm638_vm14, %v635_v27 }
 0x33c   :  { %v1108_v28 = vpop.f32.mrb[8].mxu1 }
 0x33d   :  { %v743_v29 = vrot.slane %v1108_v28, 7  ;;  %v774_v30 = vrot.slane %v1108_v28, 1  ;;  %v717_v31 = vpop.f32.mrb[9].mxu1  ;;  %759 = vrot.lane.b32.xlu0 %v1108_v28, %s1218_s3 }
 0x33e   :  { %v742_v32 = vrot.slane %v717_v31, 7  ;;  %v773_v33 = vrot.slane %v717_v31, 1  ;;  %757 = vrot.lane.b32.xlu1 %v717_v31, %s1218_s3 }
 0x340   :  { %v775_v34 = vsel %vm501_vm3, %v773_v33, %v774_v30  ;;  %v744_v35 = vsel %vm425_vm2, %v742_v32, %v743_v29 }
 0x342   :  { %794 = vrot.lane.b32.xlu1 %v775_v34, %s1219_s10 }
 0x349   :  { %v1111_v36 = vpop.f32.mrb[10].mxu1 }
 0x34a   :  { %v737_v38 = vrot.slane %v1111_v36, 7  ;;  %v778_v40 = vrot.slane %v1111_v36, 1  ;;  %763 = vrot.lane.b32.xlu0 %v1111_v36, %s1218_s3  ;;  %v727_v41 = vpop.f32.mrb[11].mxu1 }
 0x34b   :  { %v745_v42 = vrot.slane %v727_v41, 7  ;;  %v776_v43 = vrot.slane %v727_v41, 1  ;;  %761 = vrot.lane.b32.xlu1 %v727_v41, %s1218_s3 }
 0x34c   :  { %v785_v44 = vsel %vm501_vm3, %v778_v40, %v773_v33  ;;  %v752_v45 = vsel %vm425_vm2, %v737_v38, %v742_v32 }
 0x34d   :  { %v779_v46 = vsel %vm501_vm3, %v776_v43, %v778_v40  ;;  %v777_v47 = vsel %vm501_vm3, %v774_v30, %v776_v43  ;;  %v747_v51 = vsel %vm425_vm2, %v745_v42, %v737_v38  ;;  %v746_v52 = vsel %vm425_vm2, %v743_v29, %v745_v42 }
 0x34e   :  { %v787_v50 = vsel %vm524_vm8, %v777_v47, 0.0  ;;  %v789_v53 = vsel %vm526_vm12, %v785_v44, 0.0  ;;  %v753_v3 = vsel %vm441_vm7, %v752_v45, 0.0  ;;  %v755_v5 = vsel %vm443_vm11, %v746_v52, 0.0 }
 0x34f   :  { %798 = vrot.lane.b32.xlu1 %v779_v46, %s1219_s10  ;;  %796 = vrot.lane.b32.xlu0 %v787_v50, %s1219_s10  ;;  %vm960_vm7 = vcmask 7168   ;;  %vm965_vm8 = vcmask 15360  }
 0x353   :  { %810 = vrot.lane.b32.xlu1 %v1429_v14, %s1220_s11  ;;  %800 = vrot.lane.b32.xlu0 %v789_v53, %s1219_s10 }
 0x3af   :  { %v760_v55 = vpop.permute.xlu0 %759 }
 0x3b0   :  { %v758_v54 = vpop.permute.xlu1 %757  ;;  %v770_v61 = vadd.f32 %v760_v55, %v744_v35 }
 0x3b1   :  { %v769_v62 = vadd.f32 %v758_v54, %v753_v3 }
 0x3b4   :  { %v795_v56 = vpop.permute.xlu1 %794 }
 0x3b5   :  { %v806_v63 = vadd.f32 %v795_v56, %v769_v62 }
 0x3bc   :  { %v764_v57 = vpop.permute.xlu0 %763 }
 0x3bd   :  { %v762_v58 = vpop.permute.xlu1 %761  ;;  %v772_v4 = vadd.f32 %v764_v57, %v747_v51 }
 0x3be   :  { %v771_v9 = vadd.f32 %v762_v58, %v755_v5 }
 0x3c1   :  { %v799_v59 = vpop.permute.xlu1 %798  ;;  %v797_v60 = vpop.permute.xlu0 %796 }
 0x3c2   :  { %v807_v39 = vadd.f32 %v797_v60, %v770_v61  ;;  %v808_v13 = vadd.f32 %v799_v59, %v771_v9 }
 0x3c5   :  { %v811_v7 = vpop.permute.xlu1 %810  ;;  %v801_v8 = vpop.permute.xlu0 %800 }
 0x3c6   :  { %v809_v10 = vadd.f32 %v801_v8, %v772_v4  ;;  %v813_v11 = vadd.f32 %v811_v7, %v806_v63  ;;  %v814_v12 = vadd.f32 %v811_v7, %v807_v39  ;;  %v815_v0 = vadd.f32 %v811_v7, %v808_v13 }
 0x3c8   :  { %821 = vrot.lane.b32.xlu0 %v813_v11, %s1221_s12  ;;  %823 = vrot.lane.b32.xlu1 %v814_v12, %s1221_s12  ;;  %v816_v1 = vadd.f32 %v811_v7, %v809_v10 }
 0x3cc   :  { %827 = vrot.lane.b32.xlu1 %v816_v1, %s1221_s12  ;;  %825 = vrot.lane.b32.xlu0 %v815_v0, %s1221_s12 }
 0x3d0   :  { %881 = vrot.lane.b32.xlu0 %v1429_v14, %s1218_s3 }
 0x43a   :  { %v824_v15 = vpop.permute.xlu1 %823  ;;  %v822_v37 = vpop.permute.xlu0 %821 }
 0x43b   :  { %v1567_v16 = vsub.f32 %v814_v12, %v824_v15  ;;  %v1569_v17 = vsub.f32 %v813_v11, %v822_v37 }
 0x43d   :  { %v838_v18 = vand.u32 2147483647, %v1567_v16  ;;  %v837_v19 = vand.u32 2147483647, %v1569_v17  ;;  %vm870_vm15 = vcmp.ge.f32.partialorder %v1567_v16, 0.0  ;;  %vm869_vm0 = vcmp.ge.f32.partialorder %v1569_v17, 0.0 }
 0x43e   :  { %v828_v20 = vpop.permute.xlu1 %827  ;;  %v826_v21 = vpop.permute.xlu0 %825 }
 0x43f   :  { %v842_v22 = vsub.f32 0.0, %v838_v18  ;;  %v841_v23 = vsub.f32 0.0, %v837_v19  ;;  %v1573_v24 = vsub.f32 %v816_v1, %v828_v20  ;;  %v1575_v25 = vsub.f32 %v815_v0, %v826_v21 }
 0x441   :  { %v847_v26 = vmul.f32 1.442695, %v842_v22  ;;  %v845_v14 = vmul.f32 1.442695, %v841_v23  ;;  %v840_v27 = vand.u32 2147483647, %v1573_v24 }
 0x442   :  { %v839_v28 = vand.u32 2147483647, %v1575_v25  ;;  %v882_v29 = vpop.permute.xlu0 %881  ;;  %vm872_vm1 = vcmp.ge.f32.partialorder %v1573_v24, 0.0  ;;  %vm871_vm2 = vcmp.ge.f32.partialorder %v1575_v25, 0.0 }
 0x443   :  { %1182 = vpow2.f32 %v847_v26  ;;  %v844_v30 = vsub.f32 0.0, %v840_v27  ;;  %v1580_v31 = vadd.f32 %v882_v29, %v1452_v49  ;;  %v1583_v32 = vadd.f32 %v1448_v48, %v882_v29 }
 0x444   :  { %1184 = vpow2.f32 %v845_v14  ;;  %v843_v33 = vsub.f32 0.0, %v839_v28  ;;  %v1586_v34 = vadd.f32 %v882_v29, %v1481_v6  ;;  %v1589_v35 = vadd.f32 %v1474_v2, %v882_v29 }
 0x445   :  { %v851_v36 = vmul.f32 1.442695, %v844_v30  ;;  %v888_v38 = vand.u32 2147483647, %v1580_v31  ;;  %v889_v40 = vand.u32 2147483647, %v1583_v32 }
 0x446   :  { %v849_v41 = vmul.f32 1.442695, %v843_v33  ;;  %v890_v49 = vand.u32 2147483647, %v1586_v34  ;;  %v891_v42 = vand.u32 2147483647, %v1589_v35 }
 0x447   :  { %1186 = vpow2.f32 %v851_v36  ;;  %v892_v48 = vsub.f32 0.0, %v888_v38  ;;  %v893_v43 = vsub.f32 0.0, %v889_v40  ;;  %vm904_vm3 = vcmp.ge.f32.partialorder %v1580_v31, 0.0 }
 0x448   :  { %1188 = vpow2.f32 %v849_v41  ;;  %v894_v44 = vsub.f32 0.0, %v890_v49  ;;  %v895_v6 = vsub.f32 0.0, %v891_v42  ;;  %vm905_vm4 = vcmp.ge.f32.partialorder %v1583_v32, 0.0 }
 0x449   :  { %v896_v45 = vmul.f32 1.442695, %v892_v48  ;;  %v898_v46 = vmul.f32 1.442695, %v893_v43  ;;  %vm906_vm5 = vcmp.ge.f32.partialorder %v1586_v34, 0.0  ;;  %vm907_vm6 = vcmp.ge.f32.partialorder %v1589_v35, 0.0 }
 0x44a   :  { %v900_v2 = vmul.f32 1.442695, %v894_v44  ;;  %v902_v47 = vmul.f32 1.442695, %v895_v6 }
 0x44b   :  { %1190 = vpow2.f32 %v896_v45 }
 0x44c   :  { %1192 = vpow2.f32 %v898_v46 }
 0x44d   :  { %v1183_v50 = vpop.eup %1182  ;;  %1194 = vpow2.f32 %v900_v2 }
 0x44e   :  { %v1185_v51 = vpop.eup %1184  ;;  %v854_v52 = vadd.f32 1.0, %v1183_v50  ;;  %1196 = vpow2.f32 %v902_v47 }
 0x44f   :  { %v853_v53 = vadd.f32 1.0, %v1185_v51 }
 0x450   :  { %1198 = vrcp.f32 %v854_v52 }
 0x451   :  { %v1187_v54 = vpop.eup %1186  ;;  %1200 = vrcp.f32 %v853_v53 }
 0x452   :  { %v1189_v55 = vpop.eup %1188  ;;  %v856_v56 = vadd.f32 1.0, %v1187_v54 }
 0x453   :  { %v855_v57 = vadd.f32 1.0, %v1189_v55 }
 0x454   :  { %1202 = vrcp.f32 %v856_v56 }
 0x455   :  { %v1191_v58 = vpop.eup %1190  ;;  %1204 = vrcp.f32 %v855_v57 }
 0x456   :  { %v1193_v3 = vpop.eup %1192  ;;  %v908_v59 = vadd.f32 1.0, %v1191_v58 }
 0x457   :  { %v909_v60 = vadd.f32 1.0, %v1193_v3  ;;  %v1195_v61 = vpop.eup %1194 }
 0x458   :  { %1206 = vrcp.f32 %v908_v59  ;;  %v1197_v62 = vpop.eup %1196  ;;  %v910_v7 = vadd.f32 1.0, %v1195_v61 }
 0x459   :  { %1208 = vrcp.f32 %v909_v60  ;;  %v911_v8 = vadd.f32 1.0, %v1197_v62 }
 0x45a   :  { %v1199_v63 = vpop.eup %1198  ;;  %1210 = vrcp.f32 %v910_v7 }
 0x45b   :  { %v1201_v4 = vpop.eup %1200  ;;  %v860_v39 = vmul.f32 %v1199_v63, %v1183_v50  ;;  %1212 = vrcp.f32 %v911_v8 }
 0x45c   :  { %v858_v5 = vmul.f32 %v1201_v4, %v1185_v51 }
 0x45d   :  { %v874_v9 = vsel %vm870_vm15, %v1199_v63, %v860_v39  ;;  %v878_v30 = vsel %vm870_vm15, %v860_v39, %v1199_v63 }
 0x45e   :  { %v1203_v10 = vpop.eup %1202  ;;  %v873_v11 = vsel %vm869_vm0, %v1201_v4, %v858_v5  ;;  %v877_v23 = vsel %vm869_vm0, %v858_v5, %v1201_v4 }
 0x45f   :  { %v1205_v12 = vpop.eup %1204  ;;  %v864_v13 = vmul.f32 %v1203_v10, %v1187_v54 }
 0x460   :  { %v862_v1 = vmul.f32 %v1205_v12, %v1189_v55 }
 0x461   :  { %v876_v0 = vsel %vm872_vm1, %v1203_v10, %v864_v13  ;;  %v880_v14 = vsel %vm872_vm1, %v864_v13, %v1203_v10 }
 0x462   :  { %v1207_v15 = vpop.eup %1206  ;;  %v875_v37 = vsel %vm871_vm2, %v1205_v12, %v862_v1  ;;  %v879_v28 = vsel %vm871_vm2, %v862_v1, %v1205_v12 }
 0x463   :  { %v1209_v18 = vpop.eup %1208  ;;  %v920_v19 = vmul.f32 %v1207_v15, %v1191_v58 }
 0x464   :  { %v921_v20 = vmul.f32 %v1209_v18, %v1193_v3  ;;  %v1211_v26 = vpop.eup %1210 }
 0x465   :  { %v924_v21 = vsel %vm904_vm3, %v1207_v15, %v920_v19  ;;  %v1213_v27 = vpop.eup %1212  ;;  %v922_v29 = vmul.f32 %v1211_v26, %v1195_v61 }
 0x466   :  { %v925_v22 = vsel %vm905_vm4, %v1209_v18, %v921_v20  ;;  %948 = vrot.lane.b32.xlu1 %v924_v21, %s1222_s13  ;;  %v923_v31 = vmul.f32 %v1213_v27, %v1197_v62 }
 0x467   :  { %950 = vrot.lane.b32.xlu0 %v925_v22, %s1222_s13  ;;  %v926_v17 = vsel %vm906_vm5, %v1211_v26, %v922_v29 }
 0x468   :  { %v927_v24 = vsel %vm907_vm6, %v1213_v27, %v923_v31 }
 0x46a   :  { %932 = vrot.lane.b32.xlu1 %v877_v23, %s1223_s14 }
 0x46b   :  { %938 = vrot.lane.b32.xlu0 %v880_v14, %s1223_s14 }
 0x46e   :  { %936 = vrot.lane.b32.xlu1 %v879_v28, %s1223_s14 }
 0x46f   :  { %934 = vrot.lane.b32.xlu0 %v878_v30, %s1223_s14 }
 0x472   :  { %952 = vrot.lane.b32.xlu1 %v926_v17, %s1222_s13 }
 0x473   :  { %954 = vrot.lane.b32.xlu0 %v927_v24, %s1222_s13 }
 0x4d8   :  { %v949_v32 = vpop.permute.xlu1 %948 }
 0x4d9   :  { %v951_v33 = vpop.permute.xlu0 %950 }
 0x4dc   :  { %v933_v25 = vpop.permute.xlu1 %932 }
 0x4dd   :  { %v939_v36 = vpop.permute.xlu0 %938  ;;  %v961_v16 = vsel %vm960_vm7, %v873_v11, %v933_v25 }
 0x4de   :  { %v966_v38 = vsel %vm965_vm8, %v961_v16, %v949_v32  ;;  %v964_v44 = vsel %vm960_vm7, %v876_v0, %v939_v36 }
 0x4df   :  { %v971_v40 = vsel %vm970_vm9, %v966_v38, 0.0 }
 0x4e0   :  { %975 = vst [vmem:[%s1648_s5] sm:$0xff] %v971_v40  ;;  %v937_v34 = vpop.permute.xlu1 %936 }
 0x4e1   :  { %v935_v35 = vpop.permute.xlu0 %934  ;;  %v963_v48 = vsel %vm960_vm7, %v875_v37, %v937_v34 }
 0x4e2   :  { %v962_v41 = vsel %vm960_vm7, %v874_v9, %v935_v35 }
 0x4e3   :  { %v967_v49 = vsel %vm965_vm8, %v962_v41, %v951_v33 }
 0x4e4   :  { %v972_v42 = vsel %vm970_vm9, %v967_v49, 0.0  ;;  %v953_v43 = vpop.permute.xlu1 %952 }
 0x4e5   :  { %976 = vst [vmem:[%s1648_s5 + $0x8] sm:$0xff] %v972_v42  ;;  %v955_v6 = vpop.permute.xlu0 %954  ;;  %v968_v45 = vsel %vm965_vm8, %v963_v48, %v953_v43 }
 0x4e6   :  { %v969_v46 = vsel %vm965_vm8, %v964_v44, %v955_v6  ;;  %v973_v2 = vsel %vm970_vm9, %v968_v45, 0.0 }
 0x4e7   :  { %v974_v47 = vsel %vm970_vm9, %v969_v46, 0.0  ;;  %977 = vst [vmem:[%s1648_s5 + $0x10] sm:$0xff] %v973_v2 }
 0x4e8   :  { %978 = vst [vmem:[%s1648_s5 + $0x18] sm:$0xff] %v974_v47 }

</bundles_post_ra>
